<compile_context>
chip_gen: v6e
topology: v6e:2x2x1
jax: 0.10.0
libtpu: 0.0.40
codegen_flags: <defaults>
</compile_context>

<pallas_src>
import functools
import math

import jax
import jax.numpy as jnp
import numpy as np
from jax.experimental import pallas as pl
from jax.experimental.pallas import tpu as pltpu


def _cnn_kernel(*refs, K, L_out, Nb, apply_mask):
    """One grid step processes Nb batch samples.

    Lane layout inside a block (last axis): lane = position * Nb + sample,
    with Nb a multiple of 128, so every per-position chunk is a lane-aligned,
    lane-dense slice and every conv-tap shift is a static aligned offset.

    refs (apply_mask=True):
      slab_ref (1, C_in, Lp*Nb)     f32  zero-padded activations, position-major
      len_ref  (1, 1, Nb)           i32  per-sample valid length
      w_ref    (K, C_out, C_in)     f32  conv weight, tap-major
      b_ref    (C_out, 1)           f32  conv bias
      fcw_ref  (F, C_out)           f32  fc weight
      fcb_ref  (F, 1)               f32  fc bias
      x1_ref   (1, C_out, L_out*Nb) f32  conv output (masked, pre-ReLU)
      x3_ref   (1, F, Nb)           f32  classifier output (transposed)
    """
    if apply_mask:
        slab_ref, len_ref, w_ref, b_ref, fcw_ref, fcb_ref, x1_ref, x3_ref = refs
    else:
        slab_ref, w_ref, b_ref, fcw_ref, fcb_ref, x1_ref, x3_ref = refs
        len_ref = None

    slab = slab_ref[0]                              # (C_in, Lp*Nb), loaded once
    width = L_out * Nb

    # Conv1d: one tiny MXU matmul per tap against a statically shifted,
    # 128-aligned window of the padded slab (no im2col materialization).
    x1 = jnp.dot(w_ref[0], slab[:, :width], preferred_element_type=jnp.float32)
    for t in range(1, K):
        x1 = x1 + jnp.dot(w_ref[t], slab[:, t * Nb:t * Nb + width],
                          preferred_element_type=jnp.float32)
    x1 = x1 + b_ref[...]                            # (C_out, L_out*Nb)

    C_out = x1.shape[0]
    pooled = jnp.zeros((C_out, Nb), jnp.float32)

    if apply_mask:
        # Mask (x1[i, :, list_length[i]:] = 0), store x1, and accumulate the
        # ReLU'd segmented sum — all on lane-aligned (C_out, Nb) chunks.
        lens = len_ref[0]                           # (1, Nb) int32
        segs = []
        for l in range(L_out):                      # static unroll (L is small)
            seg = x1[:, l * Nb:(l + 1) * Nb]
            seg = jnp.where(lens > l, seg, 0.0)
            segs.append(seg)
            pooled = pooled + jnp.maximum(seg, 0.0)
        x1_ref[0] = jnp.concatenate(segs, axis=1)   # lane-dense single store
    else:
        x1_ref[0] = x1                              # lane-dense single store
        for l in range(L_out):
            pooled = pooled + jnp.maximum(x1[:, l * Nb:(l + 1) * Nb], 0.0)

    # AdaptiveAvgPool1d(1): mean over the full conv-output length (matches
    # PyTorch: masked positions are zeroed first, divisor is still L_out).
    pooled = pooled * (1.0 / float(L_out))          # (C_out, Nb)

    # Linear(C_out -> F), batched over the Nb samples; stored transposed.
    x3_ref[0] = (jnp.dot(fcw_ref[...], pooled, preferred_element_type=jnp.float32)
                 + fcb_ref[...])


def _pick_block_batch(N, Lp, L_out, C_in, C_out, F, budget_bytes=16 << 20):
    """Samples per block.  Always a multiple of 128 so the per-position lane
    groups (and therefore every slice, store and DMA row) are lane-dense and
    128-aligned.  Grows while the double-buffered working set stays within a
    budget that is safe on every generation (v7x only has 64 MiB VMEM) and at
    least two grid blocks remain when the batch is large enough (keeps both
    v7x TensorCores busy via the parallel grid axis; harmless on v5e/v6e)."""
    per_sample = 4 * (C_in * Lp + C_out * L_out + F + 2)   # f32 slab + x1 + x3 + len
    nb = 128
    while True:
        cand = nb * 2
        if 2 * cand * per_sample > budget_bytes or cand * 2 > N:
            break
        nb = cand
    return nb


def one_d_cnn_classifier(x, params, list_length=None):
    """x: (N, C_in, L). Returns (x3 (N, F), x1 (N, C_out, L_out)) in float32."""
    conv_w, conv_b, fc_w, fc_b = params
    N, C_in, L = x.shape
    C_out, _, K = conv_w.shape
    F = fc_w.shape[0]
    pad = (K - 1) // 2
    Lp = L + 2 * pad
    L_out = Lp - K + 1                      # == L for odd K

    Nb = _pick_block_batch(N, Lp, L_out, C_in, C_out, F)
    NB = -(-N // Nb)                        # cdiv
    N_pad = NB * Nb                         # batch padded with dummy rows

    # ----- XLA-side layout plumbing (no compute hoisted out of the kernel) --
    x32 = x.astype(jnp.float32)
    x_p = jnp.pad(x32, ((0, N_pad - N), (0, 0), (pad, pad)))     # (N_pad,C_in,Lp)
    # Position-major slab: slab[b, c, p*Nb + i] = x_p[b*Nb + i, c, p]
    slab = (x_p.reshape(NB, Nb, C_in, Lp)
                .transpose(0, 2, 3, 1)
                .reshape(NB, C_in, Lp * Nb))

    w_k = jnp.transpose(conv_w, (2, 0, 1)).astype(jnp.float32)   # (K, C_out, C_in)
    b2 = conv_b.reshape(C_out, 1).astype(jnp.float32)
    fcw = fc_w.astype(jnp.float32)                               # (F, C_out)
    fcb = fc_b.reshape(F, 1).astype(jnp.float32)

    apply_mask = list_length is not None
    inputs = [slab]
    in_specs = [pl.BlockSpec((1, C_in, Lp * Nb), lambda b: (b, 0, 0))]
    if apply_mask:
        ll = jnp.asarray(list_length).astype(jnp.int32).reshape(N)
        ll = jnp.pad(ll, (0, N_pad - N), constant_values=L_out)
        lens = ll.reshape(NB, 1, Nb)
        inputs.append(lens)
        in_specs.append(pl.BlockSpec((1, 1, Nb), lambda b: (b, 0, 0)))
    inputs += [w_k, b2, fcw, fcb]
    in_specs += [
        pl.BlockSpec((K, C_out, C_in), lambda b: (0, 0, 0)),
        pl.BlockSpec((C_out, 1), lambda b: (0, 0)),
        pl.BlockSpec((F, C_out), lambda b: (0, 0)),
        pl.BlockSpec((F, 1), lambda b: (0, 0)),
    ]

    kernel = functools.partial(_cnn_kernel, K=K, L_out=L_out, Nb=Nb,
                               apply_mask=apply_mask)

    grid_spec = pltpu.PrefetchScalarGridSpec(
        num_scalar_prefetch=0,
        grid=(NB,),
        in_specs=in_specs,
        out_specs=[
            pl.BlockSpec((1, C_out, L_out * Nb), lambda b: (b, 0, 0)),  # x1
            pl.BlockSpec((1, F, Nb), lambda b: (b, 0, 0)),              # x3
        ],
    )
    x1_blocks, x3_blocks = pl.pallas_call(
        kernel,
        grid_spec=grid_spec,
        out_shape=(
            jax.ShapeDtypeStruct((NB, C_out, L_out * Nb), jnp.float32),
            jax.ShapeDtypeStruct((NB, F, Nb), jnp.float32),
        ),
        compiler_params=pltpu.CompilerParams(
            dimension_semantics=("parallel",),
            vmem_limit_bytes=32 * 1024 * 1024,
        ),
    )(*inputs)

    # ----- Undo the block layout (pure reshapes/transposes in XLA) ----------
    x1 = (x1_blocks.reshape(NB, C_out, L_out, Nb)
                   .transpose(0, 3, 1, 2)
                   .reshape(N_pad, C_out, L_out)[:N])
    x3 = x3_blocks.transpose(0, 2, 1).reshape(N_pad, F)[:N]
    return x3, x1


def _reference(x, params, list_length=None):
    """Pure-JAX reference of the PyTorch forward (for validation)."""
    conv_w, conv_b, fc_w, fc_b = params
    K = conv_w.shape[2]
    pad = (K - 1) // 2
    x32 = x.astype(jnp.float32)
    x1 = jax.lax.conv_general_dilated(
        x32, conv_w.astype(jnp.float32), window_strides=(1,),
        padding=[(pad, pad)], dimension_numbers=('NCH', 'OIH', 'NCH'))
    x1 = x1 + conv_b.astype(jnp.float32)[None, :, None]
    if list_length is not None:
        L_out = x1.shape[-1]
        mask = (jnp.arange(L_out)[None, :]
                < jnp.asarray(list_length).astype(jnp.int32)[:, None])
        x1 = x1 * mask[:, None, :].astype(x1.dtype)
    x2 = jnp.maximum(x1, 0.0)
    x3 = jnp.mean(x2, axis=-1) @ fc_w.astype(jnp.float32).T + fc_b.astype(jnp.float32)
    return x3, x1


def init_params(key, in_channels, out_channels, kernel_size, feature_size):
    """Deterministic init matching PyTorch default uniform(-1/sqrt(fan_in), ...)."""
    k1, k2, k3, k4 = jax.random.split(key, 4)
    conv_bound = 1.0 / math.sqrt(in_channels * kernel_size)
    fc_bound = 1.0 / math.sqrt(out_channels)
    conv_w = jax.random.uniform(k1, (out_channels, in_channels, kernel_size),
                                jnp.float32, -conv_bound, conv_bound)
    conv_b = jax.random.uniform(k2, (out_channels,), jnp.float32,
                                -conv_bound, conv_bound)
    fc_w = jax.random.uniform(k3, (feature_size, out_channels), jnp.float32,
                              -fc_bound, fc_bound)
    fc_b = jax.random.uniform(k4, (feature_size,), jnp.float32,
                              -fc_bound, fc_bound)
    return conv_w, conv_b, fc_w, fc_b


if __name__ == "__main__":
    # Shapes consistent with the module's constructor:
    # in_channels=4, out_channels=8, kernel_size=3, input_size(L)=16, feature_size=5
    N, C_in, C_out, K, L, F = 2, 4, 8, 3, 16, 5

    key = jax.random.PRNGKey(0)
    kp, kx, kx2, kl2 = jax.random.split(key, 4)
    params = init_params(kp, C_in, C_out, K, F)
    x = jax.random.normal(kx, (N, C_in, L), jnp.float32)

    # Tolerances are loose enough to cover possible reduced-precision MXU
    # accumulation while still catching any layout / indexing bug.
    TOL = dict(rtol=2e-2, atol=2e-2)

    # --- list_length=None path (mask path compiled out) ---------------------
    x3, x1 = one_d_cnn_classifier(x, params, list_length=None)
    jax.block_until_ready((x3, x1))
    r3, r1 = _reference(x, params, None)
    np.testing.assert_allclose(np.asarray(x1), np.asarray(r1), **TOL)
    np.testing.assert_allclose(np.asarray(x3), np.asarray(r3), **TOL)

    # --- list_length path (in-kernel masking from int32 lengths) ------------
    list_length = jnp.array([10, 16], dtype=jnp.int32)
    x3m, x1m = one_d_cnn_classifier(x, params, list_length=list_length)
    jax.block_until_ready((x3m, x1m))
    r3m, r1m = _reference(x, params, list_length)
    np.testing.assert_allclose(np.asarray(x1m), np.asarray(r1m), **TOL)
    np.testing.assert_allclose(np.asarray(x3m), np.asarray(r3m), **TOL)

    # --- multi-block path (NB=2) with batch padding to a multiple of 128 ----
    N2 = 130
    xb = jax.random.normal(kx2, (N2, C_in, L), jnp.float32)
    llb = jax.random.randint(kl2, (N2,), 1, L + 1).astype(jnp.int32)
    x3b, x1b = one_d_cnn_classifier(xb, params, list_length=llb)
    jax.block_until_ready((x3b, x1b))
    r3b, r1b = _reference(xb, params, llb)
    np.testing.assert_allclose(np.asarray(x1b), np.asarray(r1b), **TOL)
    np.testing.assert_allclose(np.asarray(x3b), np.asarray(r3b), **TOL)

    assert x3.shape == (N, F) and x1.shape == (N, C_out, L)
    assert x3m.shape == (N, F) and x1m.shape == (N, C_out, L)
    assert x3b.shape == (N2, F) and x1b.shape == (N2, C_out, L)
    print("KERNEL_OK")
</pallas_src>

<mosaic_0001>
module attributes {stable_mosaic.version = 11 : i64} {
  func.func @_cnn_kernel(%arg0: i32, %arg1: memref<1x4x2304xf32, #tpu.memory_space<vmem>>, %arg2: memref<3x8x4xf32, #tpu.memory_space<vmem>>, %arg3: memref<8x1xf32, #tpu.memory_space<vmem>>, %arg4: memref<5x8xf32, #tpu.memory_space<vmem>>, %arg5: memref<5x1xf32, #tpu.memory_space<vmem>>, %arg6: memref<1x8x2048xf32, #tpu.memory_space<vmem>>, %arg7: memref<1x5x128xf32, #tpu.memory_space<vmem>>) attributes {dimension_semantics = [#tpu.dimension_semantics<parallel>], iteration_bounds = array<i64: 1>, scalar_prefetch = 0 : i64, scratch_operands = 0 : i64, tpu.core_type = #tpu.core_type<tc>, window_params = [{transform_indices = @transform_0, window_bounds = array<i64: 1, 4, 2304>}, {pipeline_mode = #tpu.pipeline_mode<synchronous>, transform_indices = @transform_1, window_bounds = array<i64: 3, 8, 4>}, {pipeline_mode = #tpu.pipeline_mode<synchronous>, transform_indices = @transform_2, window_bounds = array<i64: 8, 1>}, {pipeline_mode = #tpu.pipeline_mode<synchronous>, transform_indices = @transform_3, window_bounds = array<i64: 5, 8>}, {pipeline_mode = #tpu.pipeline_mode<synchronous>, transform_indices = @transform_4, window_bounds = array<i64: 5, 1>}, {transform_indices = @transform_5, window_bounds = array<i64: 1, 8, 2048>}, {transform_indices = @transform_6, window_bounds = array<i64: 1, 5, 128>}]} {
    %c0 = arith.constant 0 : index
    %c0_0 = arith.constant 0 : index
    %c0_1 = arith.constant 0 : index
    %0 = vector.load %arg1[%c0, %c0_0, %c0_1] : memref<1x4x2304xf32, #tpu.memory_space<vmem>>, vector<1x4x2304xf32>
    %1 = vector.shape_cast %0 : vector<1x4x2304xf32> to vector<4x2304xf32>
    %c0_2 = arith.constant 0 : index
    %c0_3 = arith.constant 0 : index
    %c0_4 = arith.constant 0 : index
    %2 = vector.load %arg2[%c0_2, %c0_3, %c0_4] : memref<3x8x4xf32, #tpu.memory_space<vmem>>, vector<1x8x4xf32>
    %3 = vector.shape_cast %2 : vector<1x8x4xf32> to vector<8x4xf32>
    %4 = vector.extract_strided_slice %1 {offsets = [0, 0], sizes = [4, 2048], strides = [1, 1]} : vector<4x2304xf32> to vector<4x2048xf32>
    %cst = arith.constant dense<0.000000e+00> : vector<8x2048xf32>
    %5 = tpu.matmul %3, %4, %cst {dimension_numbers = #tpu.dot_dimension_numbers<[1], [0], [0], [1], [0, 0, 1, 1], [], []>} : vector<8x4xf32>, vector<4x2048xf32>, vector<8x2048xf32> -> vector<8x2048xf32>
    %c1 = arith.constant 1 : index
    %c0_5 = arith.constant 0 : index
    %c0_6 = arith.constant 0 : index
    %6 = vector.load %arg2[%c1, %c0_5, %c0_6] : memref<3x8x4xf32, #tpu.memory_space<vmem>>, vector<1x8x4xf32>
    %7 = vector.shape_cast %6 : vector<1x8x4xf32> to vector<8x4xf32>
    %8 = vector.extract_strided_slice %1 {offsets = [0, 128], sizes = [4, 2048], strides = [1, 1]} : vector<4x2304xf32> to vector<4x2048xf32>
    %cst_7 = arith.constant dense<0.000000e+00> : vector<8x2048xf32>
    %9 = tpu.matmul %7, %8, %cst_7 {dimension_numbers = #tpu.dot_dimension_numbers<[1], [0], [0], [1], [0, 0, 1, 1], [], []>} : vector<8x4xf32>, vector<4x2048xf32>, vector<8x2048xf32> -> vector<8x2048xf32>
    %10 = arith.addf %5, %9 : vector<8x2048xf32>
    %c2 = arith.constant 2 : index
    %c0_8 = arith.constant 0 : index
    %c0_9 = arith.constant 0 : index
    %11 = vector.load %arg2[%c2, %c0_8, %c0_9] : memref<3x8x4xf32, #tpu.memory_space<vmem>>, vector<1x8x4xf32>
    %12 = vector.shape_cast %11 : vector<1x8x4xf32> to vector<8x4xf32>
    %13 = vector.extract_strided_slice %1 {offsets = [0, 256], sizes = [4, 2048], strides = [1, 1]} : vector<4x2304xf32> to vector<4x2048xf32>
    %cst_10 = arith.constant dense<0.000000e+00> : vector<8x2048xf32>
    %14 = tpu.matmul %12, %13, %cst_10 {dimension_numbers = #tpu.dot_dimension_numbers<[1], [0], [0], [1], [0, 0, 1, 1], [], []>} : vector<8x4xf32>, vector<4x2048xf32>, vector<8x2048xf32> -> vector<8x2048xf32>
    %15 = arith.addf %10, %14 : vector<8x2048xf32>
    %c0_11 = arith.constant 0 : index
    %c0_12 = arith.constant 0 : index
    %16 = vector.load %arg3[%c0_11, %c0_12] : memref<8x1xf32, #tpu.memory_space<vmem>>, vector<8x1xf32>
    %17 = vector.broadcast %16 : vector<8x1xf32> to vector<8x2048xf32>
    %18 = arith.addf %15, %17 : vector<8x2048xf32>
    %cst_13 = arith.constant 0.000000e+00 : f32
    %19 = vector.broadcast %cst_13 : f32 to vector<8x128xf32>
    %c0_14 = arith.constant 0 : index
    %c0_15 = arith.constant 0 : index
    %c0_16 = arith.constant 0 : index
    %20 = vector.load %arg6[%c0_14, %c0_15, %c0_16] : memref<1x8x2048xf32, #tpu.memory_space<vmem>>, vector<1x8x2048xf32>
    %21 = vector.shape_cast %20 : vector<1x8x2048xf32> to vector<8x2048xf32>
    %22 = vector.shape_cast %18 : vector<8x2048xf32> to vector<1x8x2048xf32>
    tpu.vector_store %arg6[%c0_14, %c0_15, %c0_16], %22 {strides = array<i32>} : memref<1x8x2048xf32, #tpu.memory_space<vmem>>, vector<1x8x2048xf32>,
    %23 = vector.extract_strided_slice %18 {offsets = [0, 0], sizes = [8, 128], strides = [1, 1]} : vector<8x2048xf32> to vector<8x128xf32>
    %cst_17 = arith.constant 0.000000e+00 : f32
    %24 = vector.broadcast %cst_17 : f32 to vector<8x128xf32>
    %25 = arith.maximumf %23, %24 : vector<8x128xf32>
    %26 = arith.addf %19, %25 : vector<8x128xf32>
    %27 = vector.extract_strided_slice %18 {offsets = [0, 128], sizes = [8, 128], strides = [1, 1]} : vector<8x2048xf32> to vector<8x128xf32>
    %cst_18 = arith.constant 0.000000e+00 : f32
    %28 = vector.broadcast %cst_18 : f32 to vector<8x128xf32>
    %29 = arith.maximumf %27, %28 : vector<8x128xf32>
    %30 = arith.addf %26, %29 : vector<8x128xf32>
    %31 = vector.extract_strided_slice %18 {offsets = [0, 256], sizes = [8, 128], strides = [1, 1]} : vector<8x2048xf32> to vector<8x128xf32>
    %cst_19 = arith.constant 0.000000e+00 : f32
    %32 = vector.broadcast %cst_19 : f32 to vector<8x128xf32>
    %33 = arith.maximumf %31, %32 : vector<8x128xf32>
    %34 = arith.addf %30, %33 : vector<8x128xf32>
    %35 = vector.extract_strided_slice %18 {offsets = [0, 384], sizes = [8, 128], strides = [1, 1]} : vector<8x2048xf32> to vector<8x128xf32>
    %cst_20 = arith.constant 0.000000e+00 : f32
    %36 = vector.broadcast %cst_20 : f32 to vector<8x128xf32>
    %37 = arith.maximumf %35, %36 : vector<8x128xf32>
    %38 = arith.addf %34, %37 : vector<8x128xf32>
    %39 = vector.extract_strided_slice %18 {offsets = [0, 512], sizes = [8, 128], strides = [1, 1]} : vector<8x2048xf32> to vector<8x128xf32>
    %cst_21 = arith.constant 0.000000e+00 : f32
    %40 = vector.broadcast %cst_21 : f32 to vector<8x128xf32>
    %41 = arith.maximumf %39, %40 : vector<8x128xf32>
    %42 = arith.addf %38, %41 : vector<8x128xf32>
    %43 = vector.extract_strided_slice %18 {offsets = [0, 640], sizes = [8, 128], strides = [1, 1]} : vector<8x2048xf32> to vector<8x128xf32>
    %cst_22 = arith.constant 0.000000e+00 : f32
    %44 = vector.broadcast %cst_22 : f32 to vector<8x128xf32>
    %45 = arith.maximumf %43, %44 : vector<8x128xf32>
    %46 = arith.addf %42, %45 : vector<8x128xf32>
    %47 = vector.extract_strided_slice %18 {offsets = [0, 768], sizes = [8, 128], strides = [1, 1]} : vector<8x2048xf32> to vector<8x128xf32>
    %cst_23 = arith.constant 0.000000e+00 : f32
    %48 = vector.broadcast %cst_23 : f32 to vector<8x128xf32>
    %49 = arith.maximumf %47, %48 : vector<8x128xf32>
    %50 = arith.addf %46, %49 : vector<8x128xf32>
    %51 = vector.extract_strided_slice %18 {offsets = [0, 896], sizes = [8, 128], strides = [1, 1]} : vector<8x2048xf32> to vector<8x128xf32>
    %cst_24 = arith.constant 0.000000e+00 : f32
    %52 = vector.broadcast %cst_24 : f32 to vector<8x128xf32>
    %53 = arith.maximumf %51, %52 : vector<8x128xf32>
    %54 = arith.addf %50, %53 : vector<8x128xf32>
    %55 = vector.extract_strided_slice %18 {offsets = [0, 1024], sizes = [8, 128], strides = [1, 1]} : vector<8x2048xf32> to vector<8x128xf32>
    %cst_25 = arith.constant 0.000000e+00 : f32
    %56 = vector.broadcast %cst_25 : f32 to vector<8x128xf32>
    %57 = arith.maximumf %55, %56 : vector<8x128xf32>
    %58 = arith.addf %54, %57 : vector<8x128xf32>
    %59 = vector.extract_strided_slice %18 {offsets = [0, 1152], sizes = [8, 128], strides = [1, 1]} : vector<8x2048xf32> to vector<8x128xf32>
    %cst_26 = arith.constant 0.000000e+00 : f32
    %60 = vector.broadcast %cst_26 : f32 to vector<8x128xf32>
    %61 = arith.maximumf %59, %60 : vector<8x128xf32>
    %62 = arith.addf %58, %61 : vector<8x128xf32>
    %63 = vector.extract_strided_slice %18 {offsets = [0, 1280], sizes = [8, 128], strides = [1, 1]} : vector<8x2048xf32> to vector<8x128xf32>
    %cst_27 = arith.constant 0.000000e+00 : f32
    %64 = vector.broadcast %cst_27 : f32 to vector<8x128xf32>
    %65 = arith.maximumf %63, %64 : vector<8x128xf32>
    %66 = arith.addf %62, %65 : vector<8x128xf32>
    %67 = vector.extract_strided_slice %18 {offsets = [0, 1408], sizes = [8, 128], strides = [1, 1]} : vector<8x2048xf32> to vector<8x128xf32>
    %cst_28 = arith.constant 0.000000e+00 : f32
    %68 = vector.broadcast %cst_28 : f32 to vector<8x128xf32>
    %69 = arith.maximumf %67, %68 : vector<8x128xf32>
    %70 = arith.addf %66, %69 : vector<8x128xf32>
    %71 = vector.extract_strided_slice %18 {offsets = [0, 1536], sizes = [8, 128], strides = [1, 1]} : vector<8x2048xf32> to vector<8x128xf32>
    %cst_29 = arith.constant 0.000000e+00 : f32
    %72 = vector.broadcast %cst_29 : f32 to vector<8x128xf32>
    %73 = arith.maximumf %71, %72 : vector<8x128xf32>
    %74 = arith.addf %70, %73 : vector<8x128xf32>
    %75 = vector.extract_strided_slice %18 {offsets = [0, 1664], sizes = [8, 128], strides = [1, 1]} : vector<8x2048xf32> to vector<8x128xf32>
    %cst_30 = arith.constant 0.000000e+00 : f32
    %76 = vector.broadcast %cst_30 : f32 to vector<8x128xf32>
    %77 = arith.maximumf %75, %76 : vector<8x128xf32>
    %78 = arith.addf %74, %77 : vector<8x128xf32>
    %79 = vector.extract_strided_slice %18 {offsets = [0, 1792], sizes = [8, 128], strides = [1, 1]} : vector<8x2048xf32> to vector<8x128xf32>
    %cst_31 = arith.constant 0.000000e+00 : f32
    %80 = vector.broadcast %cst_31 : f32 to vector<8x128xf32>
    %81 = arith.maximumf %79, %80 : vector<8x128xf32>
    %82 = arith.addf %78, %81 : vector<8x128xf32>
    %83 = vector.extract_strided_slice %18 {offsets = [0, 1920], sizes = [8, 128], strides = [1, 1]} : vector<8x2048xf32> to vector<8x128xf32>
    %cst_32 = arith.constant 0.000000e+00 : f32
    %84 = vector.broadcast %cst_32 : f32 to vector<8x128xf32>
    %85 = arith.maximumf %83, %84 : vector<8x128xf32>
    %86 = arith.addf %82, %85 : vector<8x128xf32>
    %cst_33 = arith.constant 6.250000e-02 : f32
    %87 = vector.broadcast %cst_33 : f32 to vector<8x128xf32>
    %88 = arith.mulf %86, %87 : vector<8x128xf32>
    %c0_34 = arith.constant 0 : index
    %c0_35 = arith.constant 0 : index
    %89 = vector.load %arg4[%c0_34, %c0_35] : memref<5x8xf32, #tpu.memory_space<vmem>>, vector<5x8xf32>
    %cst_36 = arith.constant dense<0.000000e+00> : vector<5x128xf32>
    %90 = tpu.matmul %89, %88, %cst_36 {dimension_numbers = #tpu.dot_dimension_numbers<[1], [0], [0], [1], [0, 0, 1, 1], [], []>} : vector<5x8xf32>, vector<8x128xf32>, vector<5x128xf32> -> vector<5x128xf32>
    %c0_37 = arith.constant 0 : index
    %c0_38 = arith.constant 0 : index
    %91 = vector.load %arg5[%c0_37, %c0_38] : memref<5x1xf32, #tpu.memory_space<vmem>>, vector<5x1xf32>
    %92 = vector.broadcast %91 : vector<5x1xf32> to vector<5x128xf32>
    %93 = arith.addf %90, %92 : vector<5x128xf32>
    %c0_39 = arith.constant 0 : index
    %c0_40 = arith.constant 0 : index
    %c0_41 = arith.constant 0 : index
    %94 = vector.load %arg7[%c0_39, %c0_40, %c0_41] : memref<1x5x128xf32, #tpu.memory_space<vmem>>, vector<1x5x128xf32>
    %95 = vector.shape_cast %94 : vector<1x5x128xf32> to vector<5x128xf32>
    %96 = vector.shape_cast %93 : vector<5x128xf32> to vector<1x5x128xf32>
    tpu.vector_store %arg7[%c0_39, %c0_40, %c0_41], %96 {strides = array<i32>} : memref<1x5x128xf32, #tpu.memory_space<vmem>>, vector<1x5x128xf32>,
    return
  }
  func.func @transform_0(%arg0: i32) -> (i32, i32, i32) {
    %c0_i32 = arith.constant 0 : i32
    %c0_i32_0 = arith.constant 0 : i32
    %c0_i32_1 = arith.constant 0 : i32
    return %arg0, %c0_i32, %c0_i32_0 : i32, i32, i32
  }
  func.func @transform_1(%arg0: i32) -> (i32, i32, i32) {
    %c0_i32 = arith.constant 0 : i32
    %c0_i32_0 = arith.constant 0 : i32
    %c0_i32_1 = arith.constant 0 : i32
    %c0_i32_2 = arith.constant 0 : i32
    return %c0_i32, %c0_i32_0, %c0_i32_1 : i32, i32, i32
  }
  func.func @transform_2(%arg0: i32) -> (i32, i32) {
    %c0_i32 = arith.constant 0 : i32
    %c0_i32_0 = arith.constant 0 : i32
    %c0_i32_1 = arith.constant 0 : i32
    return %c0_i32, %c0_i32_0 : i32, i32
  }
  func.func @transform_3(%arg0: i32) -> (i32, i32) {
    %c0_i32 = arith.constant 0 : i32
    %c0_i32_0 = arith.constant 0 : i32
    %c0_i32_1 = arith.constant 0 : i32
    return %c0_i32, %c0_i32_0 : i32, i32
  }
  func.func @transform_4(%arg0: i32) -> (i32, i32) {
    %c0_i32 = arith.constant 0 : i32
    %c0_i32_0 = arith.constant 0 : i32
    %c0_i32_1 = arith.constant 0 : i32
    return %c0_i32, %c0_i32_0 : i32, i32
  }
  func.func @transform_5(%arg0: i32) -> (i32, i32, i32) {
    %c0_i32 = arith.constant 0 : i32
    %c0_i32_0 = arith.constant 0 : i32
    %c0_i32_1 = arith.constant 0 : i32
    return %arg0, %c0_i32, %c0_i32_0 : i32, i32, i32
  }
  func.func @transform_6(%arg0: i32) -> (i32, i32, i32) {
    %c0_i32 = arith.constant 0 : i32
    %c0_i32_0 = arith.constant 0 : i32
    %c0_i32_1 = arith.constant 0 : i32
    return %arg0, %c0_i32, %c0_i32_0 : i32, i32, i32
  }
}

</mosaic_0001>

<bundles_post_ra>
// kernel: tpu_custom_call.1
= control target key start
LH: loop header
LB: loop body
LE: loop exit
PB: predicated region body
PF: predicated region fallthrough
CT: control target
= control target key end

     0   :  { %12 = vsyncpa [#allocation3], 0  ;;  %s2441_s0 = inlined_call_operand.hbm [shape: f32[1,4,2304], index: 0, kind: input, shape index: {}]   ;;  %s2442_s1 = inlined_call_operand.vmem [shape: f32[3,8,4], index: 1, kind: input, shape index: {}]   ;;  %s2443_s2 = inlined_call_operand.vmem [shape: f32[8,1], index: 2, kind: input, shape index: {}]   ;;  %s2444_s3 = inlined_call_operand.vmem [shape: f32[5,8], index: 3, kind: input, shape index: {}]   ;;  %s2445_s4 = inlined_call_operand.vmem [shape: f32[5,1], index: 4, kind: input, shape index: {}]   ;;  %s2446_s5 = inlined_call_operand.hbm [shape: f32[1,8,2048], index: 5, kind: output, shape index: {0}]   ;;  %s2447_s6 = inlined_call_operand.vmem [shape: f32[1,5,128], index: 6, kind: output, shape index: {1}]  }
   0x1   :  { %13 = vsyncpa [#allocation4], 0  ;;  %s2147_s21 = smov [#allocation2]  }
   0x2   :  { %s20_s22 = sshll.u32 %s2147_s21, 4  ;;  %s21_s22 = int_to_ptr.vmem [resolvable:$true] %s20_s22 }
   0x3   :  { %s2111_s23 = scalar_lea.vmem %s21_s22, 1152  ;;  %p2116_p1 = scmp.lt.s32.totalorder %s21_s22, %s21_s22 }
   0x4   :  { %p2112_p0 = scmp.ne.s32.totalorder %s21_s22, %s2111_s23  ;;  %p2117_p2 = scmp.lt.s32.totalorder %s2111_s23, %s2111_s23 }
   0x6   :  { %p2118_p3 = por %p2117_p2, %p2116_p1 }
   0x8   :  { %p2119_p4 = pnand %p2118_p3, %p2112_p0 }
   0xa   :  { %2122 = shalt.err (!%p2119_p4)
}
   0xb   :  { %23 = dma.hbm_to_vmem [thread:$0]  %s2441_s0, 1152, %s21_s22, [#allocation3]  }
   0xc   :  { %2143 = dma.done.wait [#allocation3], 1152  }
   0xd   :  { %2144 = vsyncadd [#allocation3], 4294966144  ;;  %v2148_v0 = vmov 0.0   ;;  %v2149_v1 = vmov 0   ;;  %vm68_vm0 = vcmask 1043456   ;;  %v2192_v2 = vld [vmem:[#allocation2 + $0x8] sm:$0xff] }
   0xe   :  { %165 = vmatprep.mubr.f32.mxu0 %v2148_v0  ;;  %236 = vmatprep.mubr.f32.mxu1 %v2148_v0  ;;  %v2194_v3 = vld [vmem:[#allocation2 + $0x10] sm:$0xff]  ;;  %v35_v4 = vld [vmem:[#allocation2] sm:$0xff]  ;;  %v2202_v6 = vcombine.high %v2192_v2, %v2192_v2  ;;  %v2006_v7 = vld [vmem:[%s2442_s1 + $0x8] sm:$0xff]  ;;  %vm64_vm1 = vcmask 31744   ;;  %vm2150_vm2 = vmmov 0   ;;  %vm1912_vm3 = vcmask 64512  }
   0xf   :  { %2093 = vset.pattern.permute.xlu0 %v2149_v1  ;;  %2007 = vmatprep.subr.msk.mxu0 %vm68_vm0, %v2192_v2  ;;  %v56_v5 = vcombine.high %v35_v4, %v35_v4  ;;  %v2207_v8 = vld [vmem:[#allocation2 + $0x18] sm:$0xff]  ;;  %v2211_v9 = vcombine.high %v2194_v3, %v2194_v3  ;;  %v2213_v10 = vld [vmem:[#allocation2 + $0x20] sm:$0xff]  ;;  %v2224_v12 = vld [vmem:[#allocation2 + $0x28] sm:$0xff]  ;;  %s2151_s10 = smov [#allocation5]  }
  0x10   :  { %2010 = vmatprep.subr.msk.mxu1 %vm68_vm0, %v2194_v3  ;;  %v2220_v11 = vcombine.high %v2207_v8, %v2207_v8  ;;  %v2232_v13 = vcombine.high %v2213_v10, %v2213_v10  ;;  %v2237_v14 = vld [vmem:[#allocation2 + $0x30] sm:$0xff]  ;;  %v2244_v15 = vcombine.high %v2224_v12, %v2224_v12  ;;  %v2248_v16 = vld [vmem:[#allocation2 + $0x38] sm:$0xff]  ;;  %v2261_v18 = vld [vmem:[#allocation2 + $0x40] sm:$0xff]  ;;  %s1993_s11 = sshll.u32 %s2151_s10, 4  ;;  %s1994_s11 = int_to_ptr.vmem [resolvable:$true] %s1993_s11 }
  0x11   :  { %2008 = vmatpush1.msk.msra.mxu0 %vm68_vm0, %v56_v5  ;;  %2011 = vmatpush1.msk.msra.mxu1 %vm68_vm0, %v2202_v6  ;;  %v2256_v17 = vcombine.high %v2237_v14, %v2237_v14  ;;  %v2268_v19 = vcombine.high %v2248_v16, %v2248_v16  ;;  %v44_v20 = vld [vmem:[%s2442_s1] sm:$0xff]  ;;  %v2055_v21 = vld [vmem:[%s2442_s1 + $0x10] sm:$0xff]  ;;  %v1244_v22 = vcombine.high %v2261_v18, %v2261_v18  ;;  %s2123_s12 = scalar_lea.vmem %s1994_s11, 2048  ;;  %p2128_p6 = scmp.lt.s32.totalorder %s1994_s11, %s1994_s11 }
  0x12   :  { %2009 = vmatmul.mubr.msk.f32.vlgmr.msra.gmra.mxu0 %vm64_vm1, %v2006_v7  ;;  %2012 = vmatmul.mubr.msk.f32.vlgmr.msra.gmra.mxu1 %vm64_vm1, %v2006_v7  ;;  %v1834_v23 = vld [vmem:[%s2443_s2] sm:$0xff]  ;;  %p2124_p5 = scmp.ne.s32.totalorder %s1994_s11, %s2123_s12  ;;  %p2129_p7 = scmp.lt.s32.totalorder %s2123_s12, %s2123_s12 }
  0x13   :  { %2013 = vmatprep.subr.msk.mxu0 %vm68_vm0, %v2207_v8  ;;  %2016 = vmatprep.subr.msk.mxu1 %vm68_vm0, %v2213_v10  ;;  %v1906_v24 = vld [vmem:[%s2445_s4] sm:$0x1f] }
  0x14   :  { %2014 = vmatpush1.msk.msra.mxu0 %vm68_vm0, %v2211_v9  ;;  %307 = vmatprep.mubr.f32.mxu0 %v2148_v0  ;;  %p2130_p8 = por %p2129_p7, %p2128_p6 }
  0x15   :  { %2017 = vmatpush1.msk.msra.mxu1 %vm68_vm0, %v2220_v11  ;;  %378 = vmatprep.mubr.f32.mxu1 %v2148_v0 }
  0x16   :  { %2015 = vmatmul.mubr.msk.f32.vlgmr.msra.gmra.mxu0 %vm64_vm1, %v2006_v7  ;;  %2018 = vmatmul.mubr.msk.f32.vlgmr.msra.gmra.mxu1 %vm64_vm1, %v2006_v7  ;;  %p2131_p9 = pnand %p2130_p8, %p2124_p5 }
  0x17   :  { %2019 = vmatprep.subr.msk.mxu0 %vm68_vm0, %v2224_v12  ;;  %2022 = vmatprep.subr.msk.mxu1 %vm68_vm0, %v2237_v14 }
  0x18   :  { %2020 = vmatpush1.msk.msra.mxu0 %vm68_vm0, %v2232_v13  ;;  %449 = vmatprep.mubr.f32.mxu0 %v2148_v0 }
  0x19   :  { %2023 = vmatpush1.msk.msra.mxu1 %vm68_vm0, %v2244_v15  ;;  %520 = vmatprep.mubr.f32.mxu1 %v2148_v0 }
  0x1a   :  { %2021 = vmatmul.mubr.msk.f32.vlgmr.msra.gmra.mxu0 %vm64_vm1, %v2006_v7  ;;  %2024 = vmatmul.mubr.msk.f32.vlgmr.msra.gmra.mxu1 %vm64_vm1, %v2006_v7 }
  0x1b   :  { %2025 = vmatprep.subr.msk.mxu0 %vm68_vm0, %v2248_v16  ;;  %2028 = vmatprep.subr.msk.mxu1 %vm68_vm0, %v2261_v18 }
  0x1c   :  { %2026 = vmatpush1.msk.msra.mxu0 %vm68_vm0, %v2256_v17  ;;  %591 = vmatprep.mubr.f32.mxu0 %v2148_v0 }
  0x1d   :  { %2029 = vmatpush1.msk.msra.mxu1 %vm68_vm0, %v2268_v19  ;;  %662 = vmatprep.mubr.f32.mxu1 %v2148_v0 }
  0x1e   :  { %2027 = vmatmul.mubr.msk.f32.vlgmr.msra.gmra.mxu0 %vm64_vm1, %v2006_v7  ;;  %2030 = vmatmul.mubr.msk.f32.vlgmr.msra.gmra.mxu1 %vm64_vm1, %v2006_v7 }
  0x1f   :  { %2031 = vmatprep.subr.msk.mxu0 %vm68_vm0, %v56_v5  ;;  %2034 = vmatprep.subr.msk.mxu1 %vm68_vm0, %v2202_v6 }
  0x20   :  { %2032 = vmatpush1.msk.msra.mxu0 %vm68_vm0, %v35_v4  ;;  %738 = vmatprep.mubr.f32.mxu0 %v2148_v0 }
  0x21   :  { %2035 = vmatpush1.msk.msra.mxu1 %vm68_vm0, %v2192_v2  ;;  %809 = vmatprep.mubr.f32.mxu1 %v2148_v0 }
  0x22   :  { %2033 = vmatmul.mubr.msk.f32.vlgmr.msra.gmra.mxu0 %vm64_vm1, %v44_v20  ;;  %2036 = vmatmul.mubr.msk.f32.vlgmr.msra.gmra.mxu1 %vm64_vm1, %v44_v20 }
  0x23   :  { %2037 = vmatprep.subr.msk.mxu0 %vm68_vm0, %v2211_v9  ;;  %2040 = vmatprep.subr.msk.mxu1 %vm68_vm0, %v2220_v11 }
  0x24   :  { %2038 = vmatpush1.msk.msra.mxu0 %vm68_vm0, %v2194_v3  ;;  %880 = vmatprep.mubr.f32.mxu0 %v2148_v0 }
  0x25   :  { %2041 = vmatpush1.msk.msra.mxu1 %vm68_vm0, %v2207_v8  ;;  %951 = vmatprep.mubr.f32.mxu1 %v2148_v0 }
  0x26   :  { %2039 = vmatmul.mubr.msk.f32.vlgmr.msra.gmra.mxu0 %vm64_vm1, %v44_v20  ;;  %2042 = vmatmul.mubr.msk.f32.vlgmr.msra.gmra.mxu1 %vm64_vm1, %v44_v20 }
  0x27   :  { %2043 = vmatprep.subr.msk.mxu0 %vm68_vm0, %v2232_v13  ;;  %2046 = vmatprep.subr.msk.mxu1 %vm68_vm0, %v2244_v15 }
  0x28   :  { %2044 = vmatpush1.msk.msra.mxu0 %vm68_vm0, %v2213_v10  ;;  %1022 = vmatprep.mubr.f32.mxu0 %v2148_v0 }
  0x29   :  { %2047 = vmatpush1.msk.msra.mxu1 %vm68_vm0, %v2224_v12  ;;  %1093 = vmatprep.mubr.f32.mxu1 %v2148_v0 }
  0x2a   :  { %2045 = vmatmul.mubr.msk.f32.vlgmr.msra.gmra.mxu0 %vm64_vm1, %v44_v20  ;;  %2048 = vmatmul.mubr.msk.f32.vlgmr.msra.gmra.mxu1 %vm64_vm1, %v44_v20 }
  0x2b   :  { %2049 = vmatprep.subr.msk.mxu0 %vm68_vm0, %v2256_v17  ;;  %2052 = vmatprep.subr.msk.mxu1 %vm68_vm0, %v2268_v19 }
  0x2c   :  { %2050 = vmatpush1.msk.msra.mxu0 %vm68_vm0, %v2237_v14  ;;  %1164 = vmatprep.mubr.f32.mxu0 %v2148_v0 }
  0x2d   :  { %2053 = vmatpush1.msk.msra.mxu1 %vm68_vm0, %v2248_v16  ;;  %1235 = vmatprep.mubr.f32.mxu1 %v2148_v0 }
  0x2e   :  { %2051 = vmatmul.mubr.msk.f32.vlgmr.msra.gmra.mxu0 %vm64_vm1, %v44_v20  ;;  %2054 = vmatmul.mubr.msk.f32.vlgmr.msra.gmra.mxu1 %vm64_vm1, %v44_v20 }
  0x2f   :  { %2056 = vmatprep.subr.msk.mxu0 %vm68_vm0, %v2202_v6  ;;  %2059 = vmatprep.subr.msk.mxu1 %vm68_vm0, %v2211_v9 }
  0x30   :  { %2057 = vmatpush1.msk.msra.mxu0 %vm68_vm0, %v2192_v2  ;;  %1314 = vmatprep.mubr.f32.mxu0 %v2148_v0 }
  0x31   :  { %2060 = vmatpush1.msk.msra.mxu1 %vm68_vm0, %v2194_v3  ;;  %1385 = vmatprep.mubr.f32.mxu1 %v2148_v0 }
  0x32   :  { %2058 = vmatmul.mubr.msk.f32.vlgmr.msra.gmra.mxu0 %vm64_vm1, %v2055_v21  ;;  %2061 = vmatmul.mubr.msk.f32.vlgmr.msra.gmra.mxu1 %vm64_vm1, %v2055_v21 }
  0x33   :  { %2062 = vmatprep.subr.msk.mxu0 %vm68_vm0, %v2220_v11  ;;  %2065 = vmatprep.subr.msk.mxu1 %vm68_vm0, %v2232_v13 }
  0x34   :  { %2063 = vmatpush1.msk.msra.mxu0 %vm68_vm0, %v2207_v8  ;;  %1456 = vmatprep.mubr.f32.mxu0 %v2148_v0 }
  0x35   :  { %2066 = vmatpush1.msk.msra.mxu1 %vm68_vm0, %v2213_v10  ;;  %1527 = vmatprep.mubr.f32.mxu1 %v2148_v0 }
  0x36   :  { %2064 = vmatmul.mubr.msk.f32.vlgmr.msra.gmra.mxu0 %vm64_vm1, %v2055_v21  ;;  %2067 = vmatmul.mubr.msk.f32.vlgmr.msra.gmra.mxu1 %vm64_vm1, %v2055_v21 }
  0x37   :  { %2068 = vmatprep.subr.msk.mxu0 %vm68_vm0, %v2244_v15  ;;  %2071 = vmatprep.subr.msk.mxu1 %vm68_vm0, %v2256_v17 }
  0x38   :  { %2069 = vmatpush1.msk.msra.mxu0 %vm68_vm0, %v2224_v12  ;;  %1598 = vmatprep.mubr.f32.mxu0 %v2148_v0 }
  0x39   :  { %2072 = vmatpush1.msk.msra.mxu1 %vm68_vm0, %v2237_v14  ;;  %1669 = vmatprep.mubr.f32.mxu1 %v2148_v0 }
  0x3a   :  { %2070 = vmatmul.mubr.msk.f32.vlgmr.msra.gmra.mxu0 %vm64_vm1, %v2055_v21  ;;  %2073 = vmatmul.mubr.msk.f32.vlgmr.msra.gmra.mxu1 %vm64_vm1, %v2055_v21 }
  0x3b   :  { %2074 = vmatprep.subr.msk.mxu0 %vm68_vm0, %v2268_v19  ;;  %2077 = vmatprep.subr.msk.mxu1 %vm68_vm0, %v1244_v22 }
  0x3c   :  { %2075 = vmatpush1.msk.msra.mxu0 %vm68_vm0, %v2248_v16  ;;  %1740 = vmatprep.mubr.f32.mxu0 %v2148_v0 }
  0x3d   :  { %2078 = vmatpush1.msk.msra.mxu1 %vm68_vm0, %v2261_v18  ;;  %1811 = vmatprep.mubr.f32.mxu1 %v2148_v0 }
  0x3e   :  { %2076 = vmatmul.mubr.msk.f32.vlgmr.msra.gmra.mxu0 %vm64_vm1, %v2055_v21  ;;  %2079 = vmatmul.mubr.msk.f32.vlgmr.msra.gmra.mxu1 %vm64_vm1, %v2055_v21 }
  0x3f   :  { %1837 = vperm.xlu0 %2093, %v1834_v23   ;;  %2083 = vmatprep.subr.mxu0 %v2148_v0 }
  0x40   :  { %2085 = vmatprep.mubr.msk.f32.mxu0 %vm2150_vm2, %v2148_v0 }
  0x43   :  { %1909 = vperm.xlu0 %2093, %v1906_v24  }
  0xba   :  { %v2407_v63 = vpop.permute.xlu0 %1837 }
  0xd2   :  { %v167_v25 = vpop.f32.mrf.mxu0  ;;  %v238_v26 = vpop.f32.mrf.mxu1 }
  0xd4   :  { %v169_v27 = vpop.f32.mrf.mxu0  ;;  %v240_v28 = vpop.f32.mrf.mxu1 }
  0xd6   :  { %v309_v29 = vpop.f32.mrf.mxu0  ;;  %v380_v30 = vpop.f32.mrf.mxu1 }
  0xd8   :  { %v311_v31 = vpop.f32.mrf.mxu0  ;;  %v382_v32 = vpop.f32.mrf.mxu1 }
  0xda   :  { %v451_v33 = vpop.f32.mrf.mxu0  ;;  %v522_v34 = vpop.f32.mrf.mxu1 }
  0xdc   :  { %v2393_v35 = vpop.f32.mrf.mxu0  ;;  %v2395_v36 = vpop.f32.mrf.mxu1 }
  0xde   :  { %v2397_v37 = vpop.f32.mrf.mxu0  ;;  %v2399_v38 = vpop.f32.mrf.mxu1 }
  0xe0   :  { %v2401_v39 = vpop.f32.mrf.mxu0  ;;  %v2403_v40 = vpop.f32.mrf.mxu1 }
  0xe2   :  { %v740_v41 = vpop.f32.mrf.mxu0  ;;  %v811_v42 = vpop.f32.mrf.mxu1 }
  0xe3   :  { %v741_v57 = vadd.f32 %v740_v41, %v167_v25  ;;  %v812_v58 = vadd.f32 %v811_v42, %v238_v26 }
  0xe4   :  { %v742_v43 = vpop.f32.mrf.mxu0  ;;  %v813_v44 = vpop.f32.mrf.mxu1 }
  0xe5   :  { %v743_v61 = vadd.f32 %v742_v43, %v169_v27  ;;  %v814_v62 = vadd.f32 %v813_v44, %v240_v28 }
  0xe6   :  { %v882_v45 = vpop.f32.mrf.mxu0  ;;  %v953_v46 = vpop.f32.mrf.mxu1 }
  0xe7   :  { %v883_v8 = vadd.f32 %v882_v45, %v309_v29  ;;  %v954_v9 = vadd.f32 %v953_v46, %v380_v30 }
  0xe8   :  { %v884_v47 = vpop.f32.mrf.mxu0  ;;  %v955_v48 = vpop.f32.mrf.mxu1 }
  0xe9   :  { %v885_v12 = vadd.f32 %v884_v47, %v311_v31  ;;  %v956_v13 = vadd.f32 %v955_v48, %v382_v32 }
  0xea   :  { %v1024_v49 = vpop.f32.mrf.mxu0  ;;  %v1095_v50 = vpop.f32.mrf.mxu1 }
  0xeb   :  { %v1025_v16 = vadd.f32 %v1024_v49, %v451_v33  ;;  %v1096_v25 = vadd.f32 %v1095_v50, %v522_v34 }
  0xec   :  { %v1026_v51 = vpop.f32.mrf.mxu0  ;;  %v1097_v52 = vpop.f32.mrf.mxu1 }
  0xed   :  { %v1027_v42 = vadd.f32 %v1026_v51, %v2393_v35  ;;  %v1098_v43 = vadd.f32 %v1097_v52, %v2395_v36 }
  0xee   :  { %v1166_v53 = vpop.f32.mrf.mxu0  ;;  %v1237_v54 = vpop.f32.mrf.mxu1 }
  0xef   :  { %v1167_v44 = vadd.f32 %v1166_v53, %v2397_v37  ;;  %v1238_v47 = vadd.f32 %v1237_v54, %v2399_v38 }
  0xf0   :  { %v1168_v55 = vpop.f32.mrf.mxu0  ;;  %v2405_v56 = vpop.f32.mrf.mxu1 }
  0xf1   :  { %v1240_v38 = vadd.f32 %v2405_v56, %v2403_v40 }
  0xf2   :  { %v1316_v59 = vpop.f32.mrf.mxu0  ;;  %v1387_v60 = vpop.f32.mrf.mxu1 }
  0xf3   :  { %v1818_v0 = vadd.f32 %v1316_v59, %v741_v57  ;;  %v1820_v1 = vadd.f32 %v1387_v60, %v812_v58  ;;  %v1169_v57 = vadd.f32 %v1168_v55, %v2401_v39 }
  0xf4   :  { %v1318_v2 = vpop.f32.mrf.mxu0  ;;  %v1389_v3 = vpop.f32.mrf.mxu1 }
  0xf5   :  { %v1840_v4 = vadd.f32 %v2407_v63, %v1818_v0  ;;  %v1842_v5 = vadd.f32 %v2407_v63, %v1820_v1  ;;  %v1819_v6 = vadd.f32 %v1318_v2, %v743_v61  ;;  %v1821_v7 = vadd.f32 %v1389_v3, %v814_v62 }
  0xf6   :  { %v1458_v10 = vpop.f32.mrf.mxu0  ;;  %v1529_v11 = vpop.f32.mrf.mxu1 }
  0xf7   :  { %1856 = vst [vmem:[#allocation5] sm:$0xff] %v1840_v4  ;;  %1858 = vst [vmem:[#allocation5 + $0x10] sm:$0xff] %v1842_v5  ;;  %v1841_v14 = vadd.f32 %v2407_v63, %v1819_v6  ;;  %v1843_v15 = vadd.f32 %v2407_v63, %v1821_v7  ;;  %v1822_v17 = vadd.f32 %v1458_v10, %v883_v8  ;;  %v1872_v21 = vmax.f32 %v1840_v4, 0.0 }
  0xf8   :  { %v1824_v18 = vadd.f32 %v1529_v11, %v954_v9  ;;  %v1460_v19 = vpop.f32.mrf.mxu0  ;;  %v1531_v20 = vpop.f32.mrf.mxu1  ;;  %v1876_v26 = vmax.f32 %v1842_v5, 0.0 }
  0xf9   :  { %1857 = vst [vmem:[#allocation5 + $0x8] sm:$0xff] %v1841_v14  ;;  %v1874_v22 = vmax.f32 %v1841_v14, 0.0  ;;  %1859 = vst [vmem:[#allocation5 + $0x18] sm:$0xff] %v1843_v15  ;;  %v1823_v23 = vadd.f32 %v1460_v19, %v885_v12  ;;  %v1825_v24 = vadd.f32 %v1531_v20, %v956_v13  ;;  %v1844_v27 = vadd.f32 %v2407_v63, %v1822_v17 }
  0xfa   :  { %v1846_v28 = vadd.f32 %v2407_v63, %v1824_v18  ;;  %v1600_v29 = vpop.f32.mrf.mxu0  ;;  %v1671_v30 = vpop.f32.mrf.mxu1  ;;  %v1878_v49 = vmax.f32 %v1843_v15, 0.0 }
  0xfb   :  { %v1875_v31 = vadd.f32 %v1874_v22, %v1872_v21  ;;  %v1845_v32 = vadd.f32 %v2407_v63, %v1823_v23  ;;  %v1847_v33 = vadd.f32 %v2407_v63, %v1825_v24  ;;  %v1826_v41 = vadd.f32 %v1600_v29, %v1025_v16  ;;  %1860 = vst [vmem:[#allocation5 + $0x20] sm:$0xff] %v1844_v27 }
  0xfc   :  { %1862 = vst [vmem:[#allocation5 + $0x30] sm:$0xff] %v1846_v28  ;;  %v1828_v34 = vadd.f32 %v1671_v30, %v1096_v25  ;;  %v1602_v45 = vpop.f32.mrf.mxu0  ;;  %v1673_v46 = vpop.f32.mrf.mxu1  ;;  %v1880_v58 = vmax.f32 %v1844_v27, 0.0  ;;  %v1884_v5 = vmax.f32 %v1846_v28, 0.0 }
  0xfd   :  { %v1877_v48 = vadd.f32 %v1876_v26, %v1875_v31  ;;  %1861 = vst [vmem:[#allocation5 + $0x28] sm:$0xff] %v1845_v32  ;;  %1863 = vst [vmem:[#allocation5 + $0x38] sm:$0xff] %v1847_v33  ;;  %v1848_v50 = vadd.f32 %v2407_v63, %v1826_v41  ;;  %v1827_v36 = vadd.f32 %v1602_v45, %v1027_v42  ;;  %v1882_v54 = vmax.f32 %v1845_v32, 0.0  ;;  %v1905_v26 = vld [vmem:[%s2444_s3] sm:$0x1f] }
  0xfe   :  { %v1850_v35 = vadd.f32 %v2407_v63, %v1828_v34  ;;  %v1829_v51 = vadd.f32 %v1673_v46, %v1098_v43  ;;  %v1742_v37 = vpop.f32.mrf.mxu0  ;;  %v1813_v52 = vpop.f32.mrf.mxu1  ;;  %v1886_v8 = vmax.f32 %v1847_v33, 0.0 }
  0xff   :  { %v1879_v53 = vadd.f32 %v1878_v49, %v1877_v48  ;;  %1864 = vst [vmem:[#allocation5 + $0x40] sm:$0xff] %v1848_v50  ;;  %v1830_v59 = vadd.f32 %v1742_v37, %v1167_v44  ;;  %v1832_v60 = vadd.f32 %v1813_v52, %v1238_v47  ;;  %v1849_v61 = vadd.f32 %v2407_v63, %v1827_v36 }
 0x100   :  { %1866 = vst [vmem:[#allocation5 + $0x50] sm:$0xff] %v1850_v35  ;;  %v1851_v39 = vadd.f32 %v2407_v63, %v1829_v51  ;;  %v1744_v55 = vpop.f32.mrf.mxu0  ;;  %v1815_v62 = vpop.f32.mrf.mxu1  ;;  %v1888_v10 = vmax.f32 %v1848_v50, 0.0  ;;  %v1892_v13 = vmax.f32 %v1850_v35, 0.0 }
 0x101   :  { %v1881_v0 = vadd.f32 %v1880_v58, %v1879_v53  ;;  %v1852_v1 = vadd.f32 %v2407_v63, %v1830_v59  ;;  %v1854_v2 = vadd.f32 %v2407_v63, %v1832_v60  ;;  %v1831_v3 = vadd.f32 %v1744_v55, %v1169_v57  ;;  %1865 = vst [vmem:[#allocation5 + $0x48] sm:$0xff] %v1849_v61 }
 0x102   :  { %1867 = vst [vmem:[#allocation5 + $0x58] sm:$0xff] %v1851_v39  ;;  %v1833_v4 = vadd.f32 %v1815_v62, %v1240_v38  ;;  %v1890_v12 = vmax.f32 %v1849_v61, 0.0  ;;  %v1894_v16 = vmax.f32 %v1851_v39, 0.0 }
 0x103   :  { %v1883_v6 = vadd.f32 %v1882_v54, %v1881_v0  ;;  %1868 = vst [vmem:[#allocation5 + $0x60] sm:$0xff] %v1852_v1  ;;  %1870 = vst [vmem:[#allocation5 + $0x70] sm:$0xff] %v1854_v2  ;;  %v1853_v40 = vadd.f32 %v2407_v63, %v1831_v3  ;;  %v1896_v18 = vmax.f32 %v1852_v1, 0.0  ;;  %v1900_v21 = vmax.f32 %v1854_v2, 0.0 }
 0x104   :  { %v1855_v56 = vadd.f32 %v2407_v63, %v1833_v4 }
 0x105   :  { %v1885_v7 = vadd.f32 %v1884_v5, %v1883_v6  ;;  %1869 = vst [vmem:[#allocation5 + $0x68] sm:$0xff] %v1853_v40  ;;  %v1898_v20 = vmax.f32 %v1853_v40, 0.0 }
 0x106   :  { %1871 = vst [vmem:[#allocation5 + $0x78] sm:$0xff] %v1855_v56  ;;  %v1902_v63 = vmax.f32 %v1855_v56, 0.0 }
 0x107   :  { %v1887_v9 = vadd.f32 %v1886_v8, %v1885_v7 }
 0x109   :  { %v1889_v11 = vadd.f32 %v1888_v10, %v1887_v9 }
 0x10b   :  { %v1891_v14 = vadd.f32 %v1890_v12, %v1889_v11 }
 0x10d   :  { %v1893_v15 = vadd.f32 %v1892_v13, %v1891_v14 }
 0x10f   :  { %v1895_v17 = vadd.f32 %v1894_v16, %v1893_v15 }
 0x111   :  { %v1897_v19 = vadd.f32 %v1896_v18, %v1895_v17 }
 0x113   :  { %v1899_v22 = vadd.f32 %v1898_v20, %v1897_v19 }
 0x115   :  { %v1901_v23 = vadd.f32 %v1900_v21, %v1899_v22 }
 0x117   :  { %v1903_v24 = vadd.f32 %v1902_v63, %v1901_v23 }
 0x119   :  { %v1904_v25 = vmul.f32 0.0625, %v1903_v24 }
 0x11b   :  { %2084 = vmatpush3.msra.mxu0 %v1904_v25 }
 0x11c   :  { %2086 = vmatmul.mubr.msk.f32.vlgmr.msra.gmra.mxu0 %vm1912_vm3, %v1905_v26 }
 0x11d   :  { %2134 = shalt.err (!%p2131_p9)
}
 0x11e   :  { %1996 = dma.vmem_to_hbm [thread:$0]  %s1994_s11, 2048, %s2446_s5, [#allocation4]   ;;  %v1910_v27 = vpop.permute.xlu0 %1909 }
 0x1dc   :  { %v1982_v28 = vpop.f32.mrf.mxu0 }
 0x1dd   :  { %v1983_v29 = vadd.f32 %v1982_v28, %v1910_v27 }
 0x1de   :  { %v2087_v30 = vpop.f32.mrf.mxu0 }
 0x1df   :  { %1986 = vst [vmem:[%s2447_s6] sm:$0x1f] %v1983_v29 }
 0x1e0   :  { %2145 = dma.done.wait [#allocation4], 2048  }
 0x1e1   :  { %2146 = vsyncadd [#allocation4], 4294965248 }
 0x1e2   :  { %2004 = vsyncpa [#allocation3], 1 }
 0x1e3   :  { %2005 = vsyncpa [#allocation4], 1 }

</bundles_post_ra>
